<compile_context>
chip_gen: v7x
topology: tpu7x:2x2x1
jax: 0.10.0
libtpu: 0.0.40
codegen_flags: <defaults>
</compile_context>

<pallas_src>
import functools
import math

import jax
import jax.numpy as jnp
import numpy as np
from jax import lax
from jax.experimental import pallas as pl
from jax.experimental.pallas import tpu as pltpu

LANE = 128
_FUSED_CHUNK = 512           # lane-chunk width for the fused-path pooling loop


def _cdiv(a, b):
    return -(-a // b)


def _round_up(a, m):
    return _cdiv(a, m) * m


def _vmem_capacity_bytes():
    try:
        return int(pltpu.get_tpu_info().vmem_capacity_bytes)
    except Exception:
        return 64 * 1024 * 1024        # conservative fallback (v7x per-core VMEM)


def _channel_conv_sigmoid(w_ref, pooled, *, k, pad, C):
    """sigmoid(Conv1d(1,1,k, zero-pad) along the channel (lane) axis) of pooled (Bt, C)."""
    if pad > 0:
        z = jnp.zeros((pooled.shape[0], pad), jnp.float32)
        pp = jnp.concatenate([z, pooled, z], axis=1)       # (Bt, C + 2*pad), in-register
    else:
        pp = pooled
    y = w_ref[0] * pp[:, 0:C]
    for t in range(1, k):                                  # k is tiny (3 or 5): VPU MADs
        y = y + w_ref[t] * pp[:, t:t + C]
    return jax.nn.sigmoid(y)                               # EUP


def _lane_sum_f32(x, hw, chunk):
    """f32 sum of x[..., :hw] over the last axis: lane-wise chunk adds (VALU), one
    deferred cross-lane (XLU) reduce at the end."""
    n_full = hw // chunk
    if n_full > 0:
        acc = x[:, :, :chunk].astype(jnp.float32)
        for c in range(1, n_full):
            acc = acc + x[:, :, c * chunk:(c + 1) * chunk].astype(jnp.float32)
        pooled = jnp.sum(acc, axis=-1)
    else:
        pooled = jnp.zeros(x.shape[:2], jnp.float32)
    rem = hw - n_full * chunk
    if rem:
        pooled = pooled + jnp.sum(
            x[:, :, n_full * chunk:hw].astype(jnp.float32), axis=-1)
    return pooled


def _eca_fused_kernel(w_ref, x_ref, o_ref, *, hw, inv_hw, k, pad, C):
    # One (Bt, C, HW) block per grid step: read x once, write the result once.
    x = x_ref[...]                                          # native dtype
    pooled = _lane_sum_f32(x, hw, _FUSED_CHUNK) * inv_hw    # (Bt, C) f32 mean over H*W
    gate = _channel_conv_sigmoid(w_ref, pooled, k=k, pad=pad, C=C)
    o_ref[...] = x * gate.astype(o_ref.dtype)[:, :, None]   # native-dtype multiply


def _pool_partial_kernel(x_ref, out_ref, acc_ref, *, hw, T, tiles_per_split, needs_mask):
    # grid = (batch blocks, spatial splits, tiles per split); reduction axis last.
    s = pl.program_id(1)
    j = pl.program_id(2)

    @pl.when(j == 0)
    def _():
        acc_ref[...] = jnp.zeros_like(acc_ref)

    x = x_ref[...]                                          # (Bt, C, T) native dtype
    acc = acc_ref[...]
    if needs_mask:
        lane = lax.broadcasted_iota(jnp.int32, (1, 1, LANE), 2)
        base = (s * tiles_per_split + j) * T
    for c in range(T // LANE):                              # lane-wise adds (VALU)
        chunk = x[:, :, c * LANE:(c + 1) * LANE].astype(jnp.float32)
        if needs_mask:
            chunk = jnp.where(lane < hw - (base + c * LANE), chunk, 0.0)
        acc = acc + chunk
    acc_ref[...] = acc

    @pl.when(j == tiles_per_split - 1)
    def _():
        out_ref[...] = jnp.sum(acc, axis=-1)[None]          # single deferred XLU reduce


def _scale_kernel(w_ref, psum_ref, x_ref, o_ref, *, inv_hw, k, pad, C):
    # Combine the parallel partial sums, (cheaply, redundantly per spatial tile) compute
    # the tiny (Bt, C) gate, then broadcast-scale the block in its native dtype.
    pooled = jnp.sum(psum_ref[...], axis=0) * inv_hw        # (Bt, C) f32
    gate = _channel_conv_sigmoid(w_ref, pooled, k=k, pad=pad, C=C)
    o_ref[...] = x_ref[...] * gate.astype(o_ref.dtype)[:, :, None]


def eca_layer(x, conv_weight, *, fused_block_bytes=None, target_block_bytes=None,
              vmem_limit_bytes=None):
    """ECA forward.

    Args:
      x:           (B, C, H, W) array (any float dtype; kept native for HBM traffic).
      conv_weight: (k,) float weights of Conv1d(1, 1, k, bias=False), squeezed.
    Returns:
      (B, C, H, W) array, same dtype as x.
    """
    B, C, H, W = x.shape
    k = int(conv_weight.shape[0])
    assert k % 2 == 1, "ECA uses an odd kernel size"
    pad = (k - 1) // 2
    HW = H * W
    dtype = x.dtype
    itemsize = jnp.dtype(dtype).itemsize
    inv_hw = 1.0 / float(HW)

    # Generation-aware budgets: ~96 MiB scoped VMEM on v5e/v6e (128 MiB), ~48 MiB on v7x.
    if vmem_limit_bytes is None:
        vmem_limit_bytes = min(_vmem_capacity_bytes() * 3 // 4, 100 * 1024 * 1024)
    if fused_block_bytes is None:
        fused_block_bytes = max(1 << 20, vmem_limit_bytes // 8)
    if target_block_bytes is None:
        target_block_bytes = max(1 << 20, vmem_limit_bytes // 12)

    w = conv_weight.astype(jnp.float32).reshape(k)
    w_spec = pl.BlockSpec(memory_space=pltpu.MemorySpace.SMEM)   # k taps in SMEM
    x_flat = x.reshape(B, C, HW)                  # free reshape, no padding / copy
    row_bytes = C * HW * itemsize

    if row_bytes <= fused_block_bytes and HW <= 65536:
        # ---- Fused single pass: whole rows (full C, full HW) per grid step ----------
        Bt = min(B, max(1, fused_block_bytes // row_bytes))
        # Keep >= 2 batch blocks (2 TensorCores on v7x) and prefer >= 4 (pipelining)
        # as long as blocks stay reasonably large.
        while Bt > 1 and _cdiv(B, Bt) < 2:
            Bt = (Bt + 1) // 2
        while (Bt > 1 and _cdiv(B, Bt) < 4
               and ((Bt + 1) // 2) * row_bytes >= (512 << 10)):
            Bt = (Bt + 1) // 2
        nb = _cdiv(B, Bt)                         # ragged last batch block is fine
        out_flat = pl.pallas_call(
            functools.partial(_eca_fused_kernel, hw=HW, inv_hw=inv_hw,
                              k=k, pad=pad, C=C),
            out_shape=jax.ShapeDtypeStruct((B, C, HW), dtype),
            grid_spec=pltpu.PrefetchScalarGridSpec(
                num_scalar_prefetch=0,
                grid=(nb,),
                in_specs=[w_spec,
                          pl.BlockSpec((Bt, C, HW), lambda b: (b, 0, 0))],
                out_specs=pl.BlockSpec((Bt, C, HW), lambda b: (b, 0, 0)),
            ),
            compiler_params=pltpu.CompilerParams(
                dimension_semantics=("parallel",),
                vmem_limit_bytes=vmem_limit_bytes),
        )(w, x_flat)
        return out_flat.reshape(B, C, H, W)

    # ---- Two-pass tiled path (very large C*H*W): bounded VMEM blocks ----------------
    Bt = 8 if B % 8 == 0 else B                   # (Bt, C) psum blocks must be legal
    nb = B // Bt

    acc_bytes = Bt * C * LANE * 4                 # deferred-reduce f32 accumulator
    in_budget = max(Bt * C * LANE * itemsize,
                    min(target_block_bytes, (vmem_limit_bytes - acc_bytes) // 3))
    t_lanes = (in_budget // (Bt * C * itemsize)) // LANE * LANE
    T = max(LANE, min(t_lanes, _round_up(HW, LANE), 16384))
    n_hw = _cdiv(HW, T)
    needs_mask = (HW % T != 0)

    # With a single batch block, split the spatial reduction into 2 parallel partial
    # sums so both v7x TensorCores stay busy in pass 1.
    n_split = 2 if (nb == 1 and n_hw >= 2 and n_hw % 2 == 0) else 1
    tiles_per_split = n_hw // n_split

    # Pass 1: masked, tiled global-average-pool partial sums -> (n_split, B, C) f32.
    psum = pl.pallas_call(
        functools.partial(_pool_partial_kernel, hw=HW, T=T,
                          tiles_per_split=tiles_per_split, needs_mask=needs_mask),
        out_shape=jax.ShapeDtypeStruct((n_split, B, C), jnp.float32),
        grid_spec=pltpu.PrefetchScalarGridSpec(
            num_scalar_prefetch=0,
            grid=(nb, n_split, tiles_per_split),
            in_specs=[pl.BlockSpec(
                (Bt, C, T), lambda b, s, j: (b, 0, s * tiles_per_split + j))],
            out_specs=pl.BlockSpec((1, Bt, C), lambda b, s, j: (s, b, 0)),
            scratch_shapes=[pltpu.VMEM((Bt, C, LANE), jnp.float32)],
        ),
        compiler_params=pltpu.CompilerParams(
            dimension_semantics=("parallel", "parallel", "arbitrary"),
            vmem_limit_bytes=vmem_limit_bytes),
    )(x_flat)

    # Pass 2 (fully parallel): combine partials, conv + sigmoid gate, broadcast-scale.
    out_flat = pl.pallas_call(
        functools.partial(_scale_kernel, inv_hw=inv_hw, k=k, pad=pad, C=C),
        out_shape=jax.ShapeDtypeStruct((B, C, HW), dtype),
        grid_spec=pltpu.PrefetchScalarGridSpec(
            num_scalar_prefetch=0,
            grid=(nb, n_hw),
            in_specs=[w_spec,
                      pl.BlockSpec((n_split, Bt, C), lambda b, j: (0, b, 0)),
                      pl.BlockSpec((Bt, C, T), lambda b, j: (b, 0, j))],
            out_specs=pl.BlockSpec((Bt, C, T), lambda b, j: (b, 0, j)),
        ),
        compiler_params=pltpu.CompilerParams(
            dimension_semantics=("parallel", "parallel"),
            vmem_limit_bytes=vmem_limit_bytes),
    )(w, psum, x_flat)
    return out_flat.reshape(B, C, H, W)


def eca_reference(x, conv_weight):
    """Pure-JAX reference for correctness checking."""
    B, C, H, W = x.shape
    k = conv_weight.shape[0]
    pad = (k - 1) // 2
    pooled = jnp.mean(x.astype(jnp.float32), axis=(2, 3))    # (B, C)
    pooled_pad = jnp.pad(pooled, ((0, 0), (pad, pad)))       # (B, C + 2*pad)
    y = jnp.zeros((B, C), jnp.float32)
    for t in range(k):
        y = y + conv_weight[t] * pooled_pad[:, t:t + C]
    gate = jax.nn.sigmoid(y)
    return (x.astype(jnp.float32) * gate[:, :, None, None]).astype(x.dtype)


if __name__ == "__main__":
    key = jax.random.PRNGKey(0)
    kx, kw = jax.random.split(key)

    B, C, H, W = 2, 4, 16, 16
    k_size = 3
    x = jax.random.normal(kx, (B, C, H, W), dtype=jnp.float32)

    # Deterministic Conv1d(1, 1, k_size, bias=False)-style weight init.
    bound = 1.0 / math.sqrt(k_size)
    conv_weight = jax.random.uniform(
        kw, (k_size,), minval=-bound, maxval=bound, dtype=jnp.float32)

    ref = eca_reference(x, conv_weight)

    # Fused single-pass path (small image fits one block).
    out_fused = jax.block_until_ready(eca_layer(x, conv_weight))
    np.testing.assert_allclose(np.asarray(out_fused), np.asarray(ref),
                               rtol=1e-5, atol=1e-5)

    # Two-pass tiled path (forced), same shape.
    out_tiled = jax.block_until_ready(eca_layer(x, conv_weight, fused_block_bytes=0))
    np.testing.assert_allclose(np.asarray(out_tiled), np.asarray(ref),
                               rtol=1e-5, atol=1e-5)

    # Non-128-multiple spatial size: exercises ragged tiles, in-kernel masking and the
    # 2-way parallel spatial split of pass 1 (no host-side padding anywhere).
    x2 = jax.random.normal(jax.random.PRNGKey(1), (2, 8, 13, 13), dtype=jnp.float32)
    ref2 = eca_reference(x2, conv_weight)
    out2f = jax.block_until_ready(eca_layer(x2, conv_weight))
    np.testing.assert_allclose(np.asarray(out2f), np.asarray(ref2),
                               rtol=1e-5, atol=1e-5)
    out2t = jax.block_until_ready(
        eca_layer(x2, conv_weight, fused_block_bytes=0, target_block_bytes=4096))
    np.testing.assert_allclose(np.asarray(out2t), np.asarray(ref2),
                               rtol=1e-5, atol=1e-5)

    # bf16 input: native-dtype broadcast multiply (gate still computed in f32).
    xb = x.astype(jnp.bfloat16)
    refb = eca_reference(xb, conv_weight)
    outb = jax.block_until_ready(eca_layer(xb, conv_weight))
    np.testing.assert_allclose(np.asarray(outb.astype(jnp.float32)),
                               np.asarray(refb.astype(jnp.float32)),
                               rtol=2e-2, atol=2e-2)

    print("KERNEL_OK")
</pallas_src>

<mosaic_0001>
module attributes {stable_mosaic.version = 11 : i64} {
  func.func @_eca_fused_kernel(%arg0: i32, %arg1: memref<3xf32, #tpu.memory_space<smem>>, %arg2: memref<1x4x256xf32, #tpu.memory_space<vmem>>, %arg3: memref<1x4x256xf32, #tpu.memory_space<vmem>>) attributes {dimension_semantics = [#tpu.dimension_semantics<parallel>], iteration_bounds = array<i64: 2>, scalar_prefetch = 0 : i64, scratch_operands = 0 : i64, tpu.core_type = #tpu.core_type<tc>, window_params = [{transform_indices = @transform_0, window_bounds = array<i64: 3>}, {transform_indices = @transform_1, window_bounds = array<i64: 1, 4, 256>}, {transform_indices = @transform_2, window_bounds = array<i64: 1, 4, 256>}]} {
    %c0 = arith.constant 0 : index
    %c0_0 = arith.constant 0 : index
    %c0_1 = arith.constant 0 : index
    %0 = vector.load %arg2[%c0, %c0_0, %c0_1] : memref<1x4x256xf32, #tpu.memory_space<vmem>>, vector<1x4x256xf32>
    %cst = arith.constant 0.000000e+00 : f32
    %1 = vector.broadcast %cst : f32 to vector<1x4xf32>
    %cst_2 = arith.constant dense<0.000000e+00> : vector<1x4xf32>
    %2 = vector.multi_reduction <add>, %0, %cst_2 [2] : vector<1x4x256xf32> to vector<1x4xf32>
    %3 = arith.addf %1, %2 : vector<1x4xf32>
    %cst_3 = arith.constant 3.906250e-03 : f32
    %4 = vector.broadcast %cst_3 : f32 to vector<1x4xf32>
    %5 = arith.mulf %3, %4 : vector<1x4xf32>
    %cst_4 = arith.constant 0.000000e+00 : f32
    %6 = vector.broadcast %cst_4 : f32 to vector<1x1xf32>
    %7 = tpu.concatenate %6, %5, %6 in 1 : vector<1x1xf32>, vector<1x4xf32>, vector<1x1xf32> -> vector<1x6xf32>
    %c0_5 = arith.constant 0 : index
    %8 = memref.load %arg1[%c0_5] : memref<3xf32, #tpu.memory_space<smem>>
    %9 = vector.extract_strided_slice %7 {offsets = [0, 0], sizes = [1, 4], strides = [1, 1]} : vector<1x6xf32> to vector<1x4xf32>
    %10 = vector.broadcast %8 : f32 to vector<1x4xf32>
    %11 = arith.mulf %10, %9 : vector<1x4xf32>
    %c1 = arith.constant 1 : index
    %12 = memref.load %arg1[%c1] : memref<3xf32, #tpu.memory_space<smem>>
    %13 = vector.extract_strided_slice %7 {offsets = [0, 1], sizes = [1, 4], strides = [1, 1]} : vector<1x6xf32> to vector<1x4xf32>
    %14 = vector.broadcast %12 : f32 to vector<1x4xf32>
    %15 = arith.mulf %14, %13 : vector<1x4xf32>
    %16 = arith.addf %11, %15 : vector<1x4xf32>
    %c2 = arith.constant 2 : index
    %17 = memref.load %arg1[%c2] : memref<3xf32, #tpu.memory_space<smem>>
    %18 = vector.extract_strided_slice %7 {offsets = [0, 2], sizes = [1, 4], strides = [1, 1]} : vector<1x6xf32> to vector<1x4xf32>
    %19 = vector.broadcast %17 : f32 to vector<1x4xf32>
    %20 = arith.mulf %19, %18 : vector<1x4xf32>
    %21 = arith.addf %16, %20 : vector<1x4xf32>
    %22 = arith.negf %21 : vector<1x4xf32>
    %23 = math.exp %22 : vector<1x4xf32>
    %cst_6 = arith.constant 1.000000e+00 : f32
    %24 = vector.broadcast %cst_6 : f32 to vector<1x4xf32>
    %25 = arith.addf %24, %23 : vector<1x4xf32>
    %26 = arith.divf %24, %25 : vector<1x4xf32>
    %27 = vector.shape_cast %26 : vector<1x4xf32> to vector<1x4x1xf32>
    %28 = vector.broadcast %27 : vector<1x4x1xf32> to vector<1x4x256xf32>
    %29 = arith.mulf %0, %28 : vector<1x4x256xf32>
    %c0_7 = arith.constant 0 : index
    %c0_8 = arith.constant 0 : index
    %c0_9 = arith.constant 0 : index
    %30 = vector.load %arg3[%c0_7, %c0_8, %c0_9] : memref<1x4x256xf32, #tpu.memory_space<vmem>>, vector<1x4x256xf32>
    tpu.vector_store %arg3[%c0_7, %c0_8, %c0_9], %29 {strides = array<i32>} : memref<1x4x256xf32, #tpu.memory_space<vmem>>, vector<1x4x256xf32>,
    return
  }
  func.func @transform_0(%arg0: i32) -> i32 {
    %c0_i32 = arith.constant 0 : i32
    %c0_i32_0 = arith.constant 0 : i32
    return %c0_i32 : i32
  }
  func.func @transform_1(%arg0: i32) -> (i32, i32, i32) {
    %c0_i32 = arith.constant 0 : i32
    %c0_i32_0 = arith.constant 0 : i32
    %c0_i32_1 = arith.constant 0 : i32
    return %arg0, %c0_i32, %c0_i32_0 : i32, i32, i32
  }
  func.func @transform_2(%arg0: i32) -> (i32, i32, i32) {
    %c0_i32 = arith.constant 0 : i32
    %c0_i32_0 = arith.constant 0 : i32
    %c0_i32_1 = arith.constant 0 : i32
    return %arg0, %c0_i32, %c0_i32_0 : i32, i32, i32
  }
}

</mosaic_0001>

<bundles_post_ra>
// kernel: tpu_custom_call.1
= control target key start
LH: loop header
LB: loop body
LE: loop exit
PB: predicated region body
PF: predicated region fallthrough
CT: control target
= control target key end

     0   :  { %7 = vsyncpa [#allocation5], 0  ;;  %s768_s0 = inlined_call_operand.hbm [shape: f32[3], index: 0, kind: input, shape index: {}]   ;;  %s769_s1 = inlined_call_operand.hbm [shape: f32[2,4,256], index: 1, kind: input, shape index: {}]   ;;  %s770_s2 = inlined_call_operand.hbm [shape: f32[2,4,256], index: 2, kind: output, shape index: {}]  }
   0x1   :  { %8 = vsyncpa [#allocation3], 0 }
   0x2   :  { %10 = vsyncpa [#allocation3 + $0x1], 0 }
   0x3   :  { %11 = vsyncpa [#allocation4], 0 }
   0x4   :  { %13 = vsyncpa [#allocation4 + $0x1], 0  ;;  %s559_s9 = smov 0   ;;  %s561_s10 = smov 0  }
   0x5   :  { %s563_s11 = smov 0   ;;  %s565_s12 = smov 0  }
   0x6 LB: > { %s580_s13 = sadd.s32 4294967295, %s536_s12   ;;  %s337_s14 = sadd.s32 4294967294, %s536_s12   ;;  %s536_s12 = sphi %s565_s12, %s791_s12   ;;  %s532_s11 = sphi %s563_s11, %s790_s11   ;;  %s528_s10 = sphi %s561_s10, %s789_s10   ;;  %s524_s9 = sphi %s559_s9, %s788_s9  }
   0x7   : > { %p60_p0 = scmp.ne.s32.totalorder %s528_s10, %s524_s9  ;;  %p771_p1 = scmp.eq.s32.totalorder %s580_s13, 0 }
   0x8   : > { %p90_p3 = scmp.eq.s32.totalorder %s337_s14, 1  ;;  %p338_p5 = scmp.ge.s32.totalorder %s536_s12, 1 }
   0x9   : > { %p589_p4 = por %p771_p1, %p60_p0  ;;  %p97_p7 = scmp.lt.s32.totalorder %s536_s12, 3 }
   0xa   : > { %p594_p6 = por %p90_p3, %p60_p0  ;;  %s605_s18 = sadd.s32 1, %s536_s12  }
   0xb   : > { %s774_s15 = scalar_select %p589_p4, 1, 0 }
   0xc   : > { %s775_s16 = scalar_select %p594_p6, 1, 0 }
   0xd   : > { %p599_p8 = pnand %p338_p5, %p97_p7  ;;  %s44_s19 = ssub.s32 %s536_s12, %s605_s18 }
   0xe   : > { %s47_s20 = sadd.s32 1, %s532_s11  ;;  %p618_p12 = scmp.eq.s32.totalorder %s44_s19, 0 }
   0xf   : > { %p366_p10 = pneg %p599_p8  ;;  %p54_p13 = scmp.ne.s32.totalorder %s532_s11, %s528_s10 }
  0x10   : > { %p55_p0 = scmp.eq.s32.totalorder %s536_s12, 0  ;;  %p379_p3 = scmp.lt.s32.totalorder %s536_s12, 2 }
  0x11   : > { %p614_p11 = pnand %p366_p10, %p771_p1  ;;  %s423_s25 = scalar_lea.hbm %s768_s0, 16 }
  0x12   : > { %p424_p5 = scmp.ne.s32.totalorder %s768_s0, %s423_s25  ;;  %p430_p1 = scmp.lt.u32.totalorder %s423_s25, %s768_s0 }
  0x13   : > { %p425_p7 = pneg %p614_p11 }
  0x15   : > { %p426_p10 = pnand %p425_p7, %p424_p5 }
  0x17   : > { %p427_p9 = pneg %p426_p10 }
  0x19   : > { %p432_p2 = pnand %p430_p1, %p427_p9 }
  0x1b   : > { %435 = shalt.err (!%p432_p2)
}
  0x1c   : > { %s538_s30 = smov [#allocation2]   ;;  %p56_p1 = por %p55_p0, %p54_p13 }
  0x1d   : > { %369 = dma.hbm_to_smem (!%p614_p11), %s768_s0, 16, %s538_s30, [#allocation5]  }
  0x1e   : > { %s645_s5 = scalar_select %p618_p12, %s532_s11, %s47_s20  }
  0x1f   : > { %p779_p2 = scmp.eq.s32.totalorder %s580_s13, 1  ;;  %s119_s7 = sand.u32 1, %s532_s11  }
  0x20   : > { %s356_s8 = sshll.u32 %s536_s12, 7  ;;  %s341_s14 = sshll.u32 %s119_s7, 3 }
  0x21   : > { %p657_p9 = por %p779_p2, %p54_p13  ;;  %s666_s23 = scalar_lea.hbm %s769_s1, %s356_s8 }
  0x22   : > { %s123_s20 = scalar_lea.vmem [#allocation6], %s341_s14  ;;  %p670_p11 = pnand %p379_p3, %p56_p1 }
  0x23   : > { %s780_s6 = scalar_select %p657_p9, 1, 0 }
  0x24   : > { %s131_s22 = sshll.u32 %s123_s20, 4  ;;  %s120_s25 = scalar_lea.sflag [#allocation3], %s119_s7  ;;  %s674_s22 = int_to_ptr.vmem [resolvable:$true] %s131_s22 }
  0x25   : > { %s436_s26 = scalar_lea.hbm %s666_s23, 128  ;;  %p438_p13 = pneg %p670_p11 }
  0x26   : > { %p437_p12 = scmp.ne.s32.totalorder %s666_s23, %s436_s26  ;;  %s441_s29 = scalar_lea.hbm %s769_s1, 256 }
  0x27   : > { %p442_p3 = scmp.lt.u32.totalorder %s666_s23, %s769_s1  ;;  %p443_p7 = scmp.lt.u32.totalorder %s441_s29, %s436_s26 }
  0x28   : > { %p439_p0 = pnand %p438_p13, %p437_p12  ;;  %p445_p1 = scmp.lt.u32.totalorder %s436_s26, %s666_s23 }
  0x29   : > { %p444_p10 = por %p443_p7, %p442_p3 }
  0x2a   : > { %p440_p5 = pneg %p439_p0 }
  0x2b   : > { %p446_p2 = por %p445_p1, %p444_p10 }
  0x2d   : > { %p447_p6 = pnand %p446_p2, %p440_p5 }
  0x2f   : > { %450 = shalt.err (!%p447_p6)
}
  0x30   : > { %s451_s4 = scalar_lea.vmem %s674_s22, 128  ;;  %s539_s7 = smov [#allocation6]  }
  0x31   : > { %p452_p12 = scmp.ne.s32.totalorder %s674_s22, %s451_s4  ;;  %s456_s8 = sshll.u32 %s539_s7, 4  ;;  %s457_s8 = int_to_ptr.vmem [resolvable:$false] %s456_s8 }
  0x32   : > { %s458_s14 = scalar_lea.vmem %s457_s8, 256  ;;  %p459_p4 = scmp.lt.s32.totalorder %s674_s22, %s457_s8 }
  0x33   : > { %p454_p0 = pnand %p452_p12, %p438_p13  ;;  %p460_p3 = scmp.lt.s32.totalorder %s458_s14, %s451_s4 }
  0x35   : > { %p455_p9 = pneg %p454_p0  ;;  %p461_p7 = por %p460_p3, %p459_p4 }
  0x37   : > { %p462_p10 = pnand %p461_p7, %p455_p9 }
  0x39   : > { %465 = shalt.err (!%p462_p10)
}
  0x3a   : > { %373 = dma.hbm_to_vmem [thread:$0]  (!%p670_p11), %s666_s23, 128, %s674_s22, %s120_s25  }
  0x3b   : > { %140 = sbr.rel (%p599_p8) target bundleno = 509 (0x1fd), region = 28  ;;  %p782_p6 = scmp.eq.s32.totalorder (!%p599_p8), %s580_s13, 0 }
  0x42   : > { %511 = dma.done.wait (%p782_p6), [#allocation5], 16   ;;  %p783_p13 = pmov %p782_p6 }
  0x43   : > { %s708_s19 = sand.u32 1, %s528_s10   ;;  %p784_p4 = scmp.ne.s32.totalorder %s774_s15, 0 }
  0x44   : > { %513 = vsyncadd (%p783_p13), [#allocation5], 4294967280  ;;  %s346_s21 = sshll.u32 %s708_s19, 3  ;;  %s147_s20 = scalar_lea.sflag [#allocation3], %s708_s19 }
  0x45   : > { %s150_s23 = scalar_lea.vmem [#allocation6], %s346_s21 }
  0x46   : > { %515 = dma.done.wait (%p784_p4), %s147_s20, 128  }
  0x47   : > { %517 = vsyncadd (%p784_p4), %s147_s20, 4294967168 }
  0x48   : > { %155 = sfence }
  0x49   : > { %v172_v0 = vld [vmem:[%s150_s23] sm:$0xff]  ;;  %vm176_vm0 = vcmask 1043456   ;;  %v185_v5 = vlaneseq  ;;  %s349_s17 = sld [smem:[#allocation2 + $0x2]]  ;;  %s348_s22 = sld [smem:[#allocation2 + $0x1]]  ;;  %vm193_vm1 = vcmask 7168   ;;  %vm195_vm2 = vcmask 39936  }
  0x4a   : > { %v174_v1 = vcombine.high %v172_v0, %v172_v0  ;;  %v177_v2 = vsel %vm176_vm0, %v172_v0, 0.0  ;;  %s540_s15 = smov 126   ;;  %s541_s24 = smov 127   ;;  %v542_v31 = vmov 839922192  }
  0x4b   : > { %v186_v6 = vand.u32 127, %v185_v5  ;;  %v189_v8 = vshrl.u32 %v185_v5, 7  ;;  %s197_s25 = sld [smem:[#allocation2]]  ;;  %v231_v32 = vunpack.c.l.s4 %v542_v31  ;;  %s357_s26 = sshll.u32 %s580_s13, 7 }
  0x4c   : > { %v178_v3 = vsel %vm176_vm0, %v174_v1, 0.0  ;;  %s171_s27 = scalar_lea.vmem [#allocation7], %s346_s21  ;;  %s724_s3 = scalar_lea.hbm %s770_s2, %s357_s26 }
  0x4d   : > { %v179_v4 = vadd.f32 %v178_v3, %v177_v2  ;;  %v187_v7 = vadd.s32 4294967295, %v186_v6  ;;  %v224_v28 = vsub.s32 0, %v189_v8  ;;  %v232_v33 = vunpack.c.0.s8 %v231_v32  ;;  %s255_s28 = sshll.u32 %s171_s27, 4  ;;  %s241_s4 = scalar_lea.sflag [#allocation4], %s708_s19  ;;  %s726_s28 = int_to_ptr.vmem [resolvable:$true] %s255_s28 }
  0x4e   : > { %s466_s7 = scalar_lea.vmem %s726_s28, 128  ;;  %p785_p9 = scmp.ne.s32.totalorder %s780_s6, 0 }
  0x4f   : > { %180 = vadd.xlane.f32.xlu0 %v179_v4  ;;  %v190_v9 = vsub.s32 %v187_v7, %v189_v8  ;;  %v209_v13 = vstv %s349_s17  ;;  %v201_v14 = vstv %s348_s22  ;;  %v235_v34 = vsub.s32 %v232_v33, %v189_v8  ;;  %p467_p8 = scmp.ne.s32.totalorder %s726_s28, %s466_s7  ;;  %s543_s13 = smov [#allocation7]  }
  0x50   : > { %s470_s8 = sshll.u32 %s543_s13, 4  ;;  %s471_s8 = int_to_ptr.vmem [resolvable:$false] %s470_s8 }
  0x51   : > { %v198_v19 = vstv %s197_s25  ;;  %p468_p11 = pnand %p467_p8, %p785_p9  ;;  %s472_s14 = scalar_lea.vmem %s471_s8, 256 }
  0x52   : > { %p473_p1 = scmp.lt.s32.totalorder %s726_s28, %s471_s8  ;;  %p474_p2 = scmp.lt.s32.totalorder %s472_s14, %s466_s7 }
  0x53   : > { %p469_p5 = pneg %p468_p11 }
  0x54   : > { %p475_p12 = por %p474_p2, %p473_p1 }
  0x56   : > { %p476_p0 = pnand %p475_p12, %p469_p5 }
  0xdc   : > { %v181_v10 = vpop.xlane.xlu0 %180 }
  0xdd   : > { %v183_v11 = vmul.f32 0.00390625, %v181_v10 }
  0xdf   : > { %v191_v12 = vrot.slane %v183_v11, %v190_v9 }
  0xe1   : > { %v194_v15 = vsel %vm193_vm1, 0.0, %v191_v12 }
  0xe2   : > { %v196_v16 = vsel %vm195_vm2, %v194_v15, 0.0 }
  0xe3   : > { %v210_v17 = vmul.f32 %v209_v13, %v196_v16  ;;  %v202_v18 = vmul.f32 %v201_v14, %v196_v16  ;;  %v199_v20 = vmul.f32 %v198_v19, %v196_v16 }
  0xe5   : > { %212 = vrot.lane.b32.xlu1 %v210_v17, %s540_s15  ;;  %204 = vrot.lane.b32.xlu0 %v202_v18, %s541_s24 }
 0x157   : > { %v205_v21 = vpop.permute.xlu0 %204  ;;  %v213_v23 = vpop.permute.xlu1 %212 }
 0x158   : > { %v207_v22 = vadd.f32 %v205_v21, %v199_v20 }
 0x15a   : > { %v215_v24 = vadd.f32 %v213_v23, %v207_v22 }
 0x15c   : > { %v350_v25 = vmul.f32 -1.442695, %v215_v24 }
 0x15e   : > { %419 = vpow2.f32 %v350_v25 }
 0x168   : > { %v420_v26 = vpop.eup %419 }
 0x169   : > { %v219_v27 = vadd.f32 1.0, %v420_v26 }
 0x16b   : > { %421 = vrcp.f32 %v219_v27 }
 0x175   : > { %v422_v29 = vpop.eup %421 }
 0x176   : > { %v225_v30 = vrot.slane %v422_v29, %v224_v28 }
 0x178   : > { %227 = vbcast.lane.b32.xlu1 %v225_v30, 256 }
 0x1ea   : > { %v228_v35 = vpop.permute.xlu1 %227 }
 0x1eb   : > { %v236_v36 = vrot.slane %v228_v35, %v235_v34 }
 0x1ed   : > { %v238_v37 = vmul.f32 %v236_v36, %v172_v0 }
 0x1ef   : > { %239 = vst [vmem:[%s171_s27] sm:$0xff] %v238_v37 }
 0x1f0   : > { %479 = shalt.err (!%p476_p0)
}
 0x1f1   : > { %s480_s19 = scalar_lea.hbm %s724_s3, 128  ;;  %s484_s23 = scalar_lea.hbm %s770_s2, 256 }
 0x1f2   : > { %p481_p3 = scmp.ne.s32.totalorder %s724_s3, %s480_s19  ;;  %p485_p6 = scmp.lt.u32.totalorder %s724_s3, %s770_s2 }
 0x1f3   : > { %p486_p13 = scmp.lt.u32.totalorder %s484_s23, %s480_s19  ;;  %p488_p8 = scmp.lt.u32.totalorder %s480_s19, %s724_s3 }
 0x1f4   : > { %p482_p7 = pnand %p481_p3, %p785_p9 }
 0x1f5   : > { %p487_p4 = por %p486_p13, %p485_p6 }
 0x1f6   : > { %p483_p10 = pneg %p482_p7 }
 0x1f7   : > { %p489_p11 = por %p488_p8, %p487_p4 }
 0x1f9   : > { %p490_p5 = pnand %p489_p11, %p483_p10 }
 0x1fb   : > { %493 = shalt.err (!%p490_p5)
}
 0x1fc   : > { %364 = dma.vmem_to_hbm [thread:$0]  (%p785_p9), %s726_s28, 128, %s724_s3, %s241_s4  }
 0x1fd PF: > { %s267_s15 = sand.u32 1, %s524_s9   ;;  %p786_p1 = scmp.ne.s32.totalorder %s775_s16, 0 }
 0x1fe   : > { %p787_p2 = scmp.ge.s32.totalorder %s536_s12, 2  ;;  %s268_s24 = scalar_lea.sflag [#allocation4], %s267_s15 }
 0x200   : > { %p375_p12 = pnand %p787_p2, %p786_p1 }
 0x202   : > { %519 = dma.done.wait (!%p375_p12), %s268_s24, 128  }
 0x203   : > { %521 = vsyncadd (!%p375_p12), %s268_s24, 4294967168  ;;  %p16_p0 = scmp.ge.s32.totalorder %s605_s18, 4   ;;  %s788_s9 = smov %s528_s10 }
 0x204   : > { %s789_s10 = smov %s532_s11  ;;  %s790_s11 = smov %s645_s5 }
 0x205   : > { %s791_s12 = smov %s605_s18  ;;  %18 = sbr.rel (!%p16_p0) target bundleno = 6 (0x6), region = 78 }
 0x20c   :  { %273 = vsyncpa [#allocation3], 1 }
 0x20d   :  { %275 = vsyncpa [#allocation3 + $0x1], 1 }
 0x20e   :  { %276 = vsyncpa [#allocation4], 1 }
 0x20f   :  { %278 = vsyncpa [#allocation4 + $0x1], 1 }
 0x210   :  { %279 = vsyncpa [#allocation5], 1 }
 0x211   :  { %281 = vsyncpa [#allocation5 + $0x1], 1 }

</bundles_post_ra>
